<compile_context>
chip_gen: v5e
topology: v5e:2x2
jax: 0.10.0
libtpu: 0.0.40
codegen_flags: <defaults>
</compile_context>

<pallas_src>
import functools

import jax
import jax.numpy as jnp
from jax.experimental import pallas as pl
from jax.experimental.pallas import tpu as pltpu


# ---------------------------------------------------------------------------
# Kernels
# ---------------------------------------------------------------------------

def _linear_kernel_small(x_ref, w_ref, b_ref, o_ref):
    # Whole problem resident in VMEM: one MXU call + bias add.
    o_ref[...] = (
        jnp.dot(x_ref[...], w_ref[...], preferred_element_type=jnp.float32)
        + b_ref[...]
    ).astype(o_ref.dtype)


def _linear_kernel_tiled(x_ref, w_ref, b_ref, o_ref):
    # x_ref: (tm, tk) bf16, w_ref: (tk, tn) bf16, b_ref: (1, tn) f32,
    # o_ref: (tm, tn) f32.  o_ref's index map ignores k, so it stays resident
    # in VMEM across the K grid axis and doubles as the f32 accumulator.
    k = pl.program_id(2)

    @pl.when(k == 0)
    def _():
        o_ref[...] = jnp.zeros_like(o_ref)

    o_ref[...] += jnp.dot(
        x_ref[...], w_ref[...], preferred_element_type=jnp.float32
    )

    @pl.when(k == pl.num_programs(2) - 1)
    def _():
        # Bias added once per output tile, in the finalize branch only.
        o_ref[...] += b_ref[...]


# ---------------------------------------------------------------------------
# Wrappers
# ---------------------------------------------------------------------------

def _round_up(v, m):
    return ((v + m - 1) // m) * m


@jax.jit
def _linear_small(x, w_t, b2d):
    M, _ = x.shape
    N = w_t.shape[1]
    return pl.pallas_call(
        _linear_kernel_small,
        out_shape=jax.ShapeDtypeStruct((M, N), jnp.float32),
    )(x, w_t, b2d)


@functools.partial(jax.jit, static_argnames=("tm", "tn", "tk"))
def _linear_tiled(x, w_t, b, *, tm, tn, tk):
    M, K = x.shape
    N = w_t.shape[1]

    # bf16 MXU operands (f32 accumulation in-kernel keeps the result accurate).
    # Cast before the optional pad so any pad pass moves half the bytes.
    x_bf = x.astype(jnp.bfloat16)
    w_bf = w_t.astype(jnp.bfloat16)

    Mp, Kp, Np = _round_up(M, tm), _round_up(K, tk), _round_up(N, tn)
    if (Mp, Kp) != (M, K):
        x_bf = jnp.pad(x_bf, ((0, Mp - M), (0, Kp - K)))
    if (Kp, Np) != (K, N):
        w_bf = jnp.pad(w_bf, ((0, Kp - K), (0, Np - N)))
    b2d = (b if Np == N else jnp.pad(b, ((0, Np - N),))).reshape(1, Np)

    grid = (Mp // tm, Np // tn, Kp // tk)

    # Advisory cost estimate for XLA scheduling of the custom call.
    flops = 2 * Mp * Np * Kp
    bytes_accessed = (
        Mp * Kp * 2 * (Np // tn)      # x re-streamed once per N tile (bf16)
        + Kp * Np * 2 * (Mp // tm)    # w_t re-streamed once per M tile (bf16)
        + Mp * Np * 4                 # output written once (f32)
        + Np * 4                      # bias
    )

    out = pl.pallas_call(
        _linear_kernel_tiled,
        out_shape=jax.ShapeDtypeStruct((Mp, Np), jnp.float32),
        grid=grid,
        in_specs=[
            pl.BlockSpec((tm, tk), lambda i, j, k: (i, k)),   # x tile
            pl.BlockSpec((tk, tn), lambda i, j, k: (k, j)),   # w_t tile
            pl.BlockSpec((1, tn), lambda i, j, k: (0, j)),    # bias tile (only re-DMA'd on j change)
        ],
        out_specs=pl.BlockSpec((tm, tn), lambda i, j, k: (i, j)),
        compiler_params=pltpu.CompilerParams(
            # M / N axes independent -> shardable across v7x's 2 TensorCores;
            # K is the reduction axis with the resident output/accumulator.
            dimension_semantics=("parallel", "parallel", "arbitrary"),
        ),
        cost_estimate=pl.CostEstimate(
            flops=flops, transcendentals=0, bytes_accessed=bytes_accessed
        ),
    )(x_bf, w_bf, b2d)

    if (Mp, Np) != (M, N):
        out = out[:M, :N]
    return out


# Fast-path size limit: everything (x, w_t, out) fits in a few MiB of VMEM.
_SMALL_TOTAL_ELEMS = 2 * 1024 * 1024   # ~8 MiB as f32


def linear_pallas(x, w_t, b):
    """y = x @ w_t + b  (equivalent to nn.Linear(dim_input, dim_output) forward).

    x:   (M, K) float32
    w_t: (K, N) float32   (transposed PyTorch weight, i.e. W.T)
    b:   (N,)   float32
    """
    M, K = x.shape
    K2, N = w_t.shape
    assert K == K2, "x / w_t contraction dims must match"
    assert b.shape == (N,)

    total = M * K + K * N + M * N
    if M <= 512 and K <= 1024 and N <= 1024 and total <= _SMALL_TOTAL_ELEMS:
        # Single-block fast path: no padding, no tiling overhead.
        return _linear_small(x, w_t, b.reshape(1, N))

    # Tiled path: tile sizes clamped to the (padded) problem size; bf16 tile
    # footprints stay at a few MiB -> fits default scoped VMEM on v5e/v6e/v7x.
    tm = min(256, _round_up(M, 128))
    tn = min(512, _round_up(N, 128))
    tk = min(512, _round_up(K, 128))
    # Give both of v7x's TensorCores work on the "parallel" axes if possible.
    if pl.cdiv(M, tm) * pl.cdiv(N, tn) < 2:
        if N > 128:
            tn = max(128, _round_up(pl.cdiv(N, 2), 128))
        elif M > 128:
            tm = max(128, _round_up(pl.cdiv(M, 2), 128))
    return _linear_tiled(x, w_t, b, tm=tm, tn=tn, tk=tk)


# ---------------------------------------------------------------------------
# Self-test
# ---------------------------------------------------------------------------

if __name__ == "__main__":
    key = jax.random.PRNGKey(0)
    k_x, k_w, k_b, k_x2, k_w2, k_b2 = jax.random.split(key, 6)

    # --- 1) The actual Network shape: Network(dim_input=32, dim_output=16) ---
    batch, dim_input, dim_output = 8, 32, 16
    bound = 1.0 / (dim_input ** 0.5)
    weight = jax.random.uniform(
        k_w, (dim_output, dim_input), jnp.float32, minval=-bound, maxval=bound
    )
    bias = jax.random.uniform(
        k_b, (dim_output,), jnp.float32, minval=-bound, maxval=bound
    )
    x = jax.random.normal(k_x, (batch, dim_input), jnp.float32)

    y = linear_pallas(x, weight.T, bias)
    jax.block_until_ready(y)

    y_ref = x @ weight.T + bias
    assert y.shape == (batch, dim_output)
    assert jnp.allclose(y, y_ref, atol=1e-5, rtol=1e-5), "small-path mismatch"

    # --- 2) Exercise the tiled bf16 path on a larger, non-aligned shape ------
    M2, K2, N2 = 200, 1100, 300
    bound2 = 1.0 / (K2 ** 0.5)
    w2 = jax.random.uniform(k_w2, (N2, K2), jnp.float32, minval=-bound2, maxval=bound2)
    b2 = jax.random.uniform(k_b2, (N2,), jnp.float32, minval=-bound2, maxval=bound2)
    x2 = jax.random.normal(k_x2, (M2, K2), jnp.float32)

    y2 = linear_pallas(x2, w2.T, b2)
    jax.block_until_ready(y2)

    # Reference with the same bf16 operand rounding (f32 accumulation).
    y2_ref = (
        jnp.dot(
            x2.astype(jnp.bfloat16).astype(jnp.float32),
            w2.T.astype(jnp.bfloat16).astype(jnp.float32),
            precision=jax.lax.Precision.HIGHEST,
        )
        + b2
    )
    assert y2.shape == (M2, N2)
    assert jnp.allclose(y2, y2_ref, atol=1e-3, rtol=1e-3), "tiled-path mismatch"

    print("KERNEL_OK")
</pallas_src>

<mosaic_0001>
module attributes {stable_mosaic.version = 11 : i64} {
  func.func @_linear_kernel_small(%arg0: memref<8x32xf32, #tpu.memory_space<vmem>>, %arg1: memref<32x16xf32, #tpu.memory_space<vmem>>, %arg2: memref<1x16xf32, #tpu.memory_space<vmem>>, %arg3: memref<8x16xf32, #tpu.memory_space<vmem>>) attributes {dimension_semantics = [], scalar_prefetch = 0 : i64, scratch_operands = 0 : i64, tpu.core_type = #tpu.core_type<tc>} {
    %c0 = arith.constant 0 : index
    %c0_0 = arith.constant 0 : index
    %0 = vector.load %arg0[%c0, %c0_0] : memref<8x32xf32, #tpu.memory_space<vmem>>, vector<8x32xf32>
    %c0_1 = arith.constant 0 : index
    %c0_2 = arith.constant 0 : index
    %1 = vector.load %arg1[%c0_1, %c0_2] : memref<32x16xf32, #tpu.memory_space<vmem>>, vector<32x16xf32>
    %cst = arith.constant dense<0.000000e+00> : vector<8x16xf32>
    %2 = tpu.matmul %0, %1, %cst {dimension_numbers = #tpu.dot_dimension_numbers<[1], [0], [0], [1], [0, 0, 1, 1], [], []>} : vector<8x32xf32>, vector<32x16xf32>, vector<8x16xf32> -> vector<8x16xf32>
    %c0_3 = arith.constant 0 : index
    %c0_4 = arith.constant 0 : index
    %3 = vector.load %arg2[%c0_3, %c0_4] : memref<1x16xf32, #tpu.memory_space<vmem>>, vector<1x16xf32>
    %4 = vector.broadcast %3 : vector<1x16xf32> to vector<8x16xf32>
    %5 = arith.addf %2, %4 : vector<8x16xf32>
    %c0_5 = arith.constant 0 : index
    %c0_6 = arith.constant 0 : index
    %6 = vector.load %arg3[%c0_5, %c0_6] : memref<8x16xf32, #tpu.memory_space<vmem>>, vector<8x16xf32>
    tpu.vector_store %arg3[%c0_5, %c0_6], %5 {strides = array<i32>} : memref<8x16xf32, #tpu.memory_space<vmem>>, vector<8x16xf32>,
    return
  }
}

</mosaic_0001>

<bundles_post_ra>
// kernel: _linear_small.1
= control target key start
LH: loop header
LB: loop body
LE: loop exit
PB: predicated region body
PF: predicated region fallthrough
CT: control target
= control target key end

     0   :  { %s137_s0 = inlined_call_operand.vmem [shape: f32[8,32], index: 0, kind: input, shape index: {}]   ;;  %s138_s1 = inlined_call_operand.vmem [shape: f32[32,16], index: 1, kind: input, shape index: {}]   ;;  %s139_s2 = inlined_call_operand.vmem [shape: f32[1,16], index: 2, kind: input, shape index: {}]   ;;  %s140_s3 = inlined_call_operand.hbm [shape: f32[8,16], index: 3, kind: output, shape index: {}]  }
   0x1   :  { %v19_v0 = vld [vmem:[%s138_s1 + $0x18] sm:$0xff]  ;;  %v18_v1 = vld [vmem:[%s138_s1 + $0x10] sm:$0xff]  ;;  %v17_v2 = vld [vmem:[%s138_s1 + $0x8] sm:$0xff] }
   0x2   :  { %40 = vmatpush.msra.mxu0 %v19_v0 }
   0x3   :  { %8 = vsyncpa [#allocation3], 0  ;;  %v16_v3 = vld [vmem:[%s138_s1] sm:$0xff]  ;;  %vm24_vm0 = vcmask 261120   ;;  %s95_s24 = smov [#allocation2]   ;;  %s57_s28 = sshll.u32 %s140_s3, 4  ;;  %s58_s28 = int_to_ptr.hbm [resolvable:$true] %s57_s28 }
   0x4   :  { %41 = vmatpush.msra.mxu0 %v18_v1  ;;  %v15_v4 = vld [vmem:[%s137_s0] sm:$0xff]  ;;  %s55_s25 = sshll.u32 %s95_s24, 4  ;;  %vm48_vm1 = vcmask 130048   ;;  %s56_s25 = int_to_ptr.vmem [resolvable:$true] %s55_s25 }
   0x5   :  { %v68_v5 = vld [vmem:[%s139_s2] ss:$0 sm:$0xff] }
   0x6   :  { %42 = vmatpush.msra.mxu0 %v17_v2 }
   0x8   :  { %43 = vmatpush.msra.mxu0 %v16_v3 }
   0x9   :  { %66 = vmatmul.msk.f32.vlgmr.msra.gmra.mxu0 %vm24_vm0, %v15_v4 }
  0x86   :  { %v45_v6 = vpop.f32.mrf.mxu0 }
  0x87   :  { %v46_v7 = vadd.f32 %v68_v5, %v45_v6 }
  0x89   :  { %49 = vst.msk [vmem:[#allocation2] sm:$0xff] %vm48_vm1, %v46_v7 }
  0x8a   :  { %60 = dma.vmem_to_hbm [thread:$0]  %s56_s25, 128, %s58_s28, [#allocation3]  }
  0x8b   :  { %93 = dma.done.wait [#allocation3], 128  }
  0x8c   :  { %94 = vsyncadd [#allocation3], 4294967168 }
  0x8d   :  { %65 = vsyncpa [#allocation3], 1 }

</bundles_post_ra>
